<compile_context>
chip_gen: v5e
topology: v5e:2x2
jax: 0.10.0
libtpu: 0.0.40
codegen_flags: <defaults>
</compile_context>

<pallas_src>
import functools

import jax
import jax.numpy as jnp
from jax.experimental import pallas as pl
from jax.experimental.pallas import tpu as pltpu

BN_EPS = 1e-5


def _mlp_kernel(x_ref, w0_ref, b0_ref, w1_ref, b1_ref, w2_ref, b2_ref, o_ref):
    # x: (TILE_B, F_in) bf16; weights bf16; biases f32.
    x = x_ref[...]

    # Layer 0: Linear (BatchNorm already folded into w0/b0) -> ReLU -> Dropout(identity)
    h = jnp.dot(x, w0_ref[...], preferred_element_type=jnp.float32) + b0_ref[...]
    h = jnp.maximum(h, 0.0)

    # Hidden layer 1: Linear -> ReLU -> Dropout(identity)
    h = jnp.dot(h.astype(jnp.bfloat16), w1_ref[...],
                preferred_element_type=jnp.float32) + b1_ref[...]
    h = jnp.maximum(h, 0.0)

    # Output layer: Linear
    o = jnp.dot(h.astype(jnp.bfloat16), w2_ref[...],
                preferred_element_type=jnp.float32) + b2_ref[...]
    o_ref[...] = o.astype(o_ref.dtype)


def _round_up(n, m):
    return ((n + m - 1) // m) * m


@functools.partial(jax.jit, static_argnames=("tile_b",))
def enhanced_nn_forward(x, params, *, tile_b=512):
    """Fused eval-mode MLP forward.  x: (B, inputs) f32.  Returns (B, outputs) f32."""
    B, F_in = x.shape
    H0 = params["w0"].shape[1]
    H1 = params["w1"].shape[1]
    outputs = params["w2"].shape[1]

    # --- Fold eval-mode BatchNorm1d into layer 0 (wrapper-time, zero kernel cost) ---
    inv_std = jax.lax.rsqrt(params["running_var"] + BN_EPS)          # (1, H0)
    scale = params["gamma"] * inv_std                                 # (1, H0)
    w0f = params["w0"] * scale                                        # (F_in, H0)
    b0f = (params["b0"] - params["running_mean"]) * scale + params["beta"]

    # --- bf16 matmul operands (f32 accumulation inside the kernel) ---
    w0_bf = w0f.astype(jnp.bfloat16)
    w1_bf = params["w1"].astype(jnp.bfloat16)
    w2_bf = params["w2"].astype(jnp.bfloat16)
    b0 = b0f.astype(jnp.float32)
    b1 = params["b1"].astype(jnp.float32)
    b2 = params["b2"].astype(jnp.float32)

    # --- Batch tiling: pad B to a multiple of the tile (tile is a multiple of 8) ---
    tile = min(tile_b, _round_up(B, 8))
    tile = _round_up(tile, 8)
    B_pad = _round_up(B, tile)
    x_pad = jnp.zeros((B_pad, F_in), jnp.bfloat16).at[:B].set(x.astype(jnp.bfloat16))
    grid = (B_pad // tile,)

    const = lambda shape: pl.BlockSpec(shape, lambda i: (0, 0))

    out = pl.pallas_call(
        _mlp_kernel,
        out_shape=jax.ShapeDtypeStruct((B_pad, outputs), jnp.float32),
        grid=grid,
        in_specs=[
            pl.BlockSpec((tile, F_in), lambda i: (i, 0)),   # x: streamed over batch
            const((F_in, H0)), const((1, H0)),              # w0', b0' (resident)
            const((H0, H1)), const((1, H1)),                # w1, b1
            const((H1, outputs)), const((1, outputs)),      # w2, b2
        ],
        out_specs=pl.BlockSpec((tile, outputs), lambda i: (i, 0)),
        compiler_params=pltpu.CompilerParams(
            dimension_semantics=("parallel",),
        ),
    )(x_pad, w0_bf, b0, w1_bf, b1, w2_bf, b2)

    return out[:B]


def init_params(key, inputs, hidden_layers, outputs):
    """Deterministic init mimicking PyTorch defaults (uniform +/- 1/sqrt(fan_in))."""
    h0, h1 = hidden_layers
    ks = jax.random.split(key, 6)

    def lin(kw, kb, fan_in, fan_out):
        bound = 1.0 / jnp.sqrt(fan_in)
        w = jax.random.uniform(kw, (fan_in, fan_out), jnp.float32, -bound, bound)
        b = jax.random.uniform(kb, (1, fan_out), jnp.float32, -bound, bound)
        return w, b

    w0, b0 = lin(ks[0], ks[1], inputs, h0)
    w1, b1 = lin(ks[2], ks[3], h0, h1)
    w2, b2 = lin(ks[4], ks[5], h1, outputs)

    return {
        "w0": w0, "b0": b0,
        "gamma": jnp.ones((1, h0), jnp.float32),
        "beta": jnp.zeros((1, h0), jnp.float32),
        "running_mean": jnp.zeros((1, h0), jnp.float32),
        "running_var": jnp.ones((1, h0), jnp.float32),
        "w1": w1, "b1": b1,
        "w2": w2, "b2": b2,
    }


def reference_forward(x, p):
    """Precision-matched pure-JAX reference (bf16 operands, f32 accumulation)."""
    inv_std = jax.lax.rsqrt(p["running_var"] + BN_EPS)
    scale = p["gamma"] * inv_std
    w0f = (p["w0"] * scale).astype(jnp.bfloat16)
    b0f = (p["b0"] - p["running_mean"]) * scale + p["beta"]
    h = jnp.dot(x.astype(jnp.bfloat16), w0f, preferred_element_type=jnp.float32) + b0f
    h = jnp.maximum(h, 0.0)
    h = jnp.dot(h.astype(jnp.bfloat16), p["w1"].astype(jnp.bfloat16),
                preferred_element_type=jnp.float32) + p["b1"]
    h = jnp.maximum(h, 0.0)
    return jnp.dot(h.astype(jnp.bfloat16), p["w2"].astype(jnp.bfloat16),
                   preferred_element_type=jnp.float32) + p["b2"]


if __name__ == "__main__":
    key = jax.random.PRNGKey(0)
    k_x, k_p = jax.random.split(key)

    inputs, hidden_layers, outputs = 16, [32, 32], 1
    batch = 8

    x = jax.random.normal(k_x, (batch, inputs), dtype=jnp.float32)
    params = init_params(k_p, inputs, hidden_layers, outputs)

    out = enhanced_nn_forward(x, params)
    jax.block_until_ready(out)

    ref = reference_forward(x, params)
    assert out.shape == (batch, outputs)
    assert jnp.allclose(out, ref, atol=1e-3, rtol=1e-3), "mismatch vs JAX reference"

    # Also exercise a batch that is not a multiple of the tile size.
    x_big = jax.random.normal(k_x, (1037, inputs), dtype=jnp.float32)
    out_big = enhanced_nn_forward(x_big, params, tile_b=512)
    jax.block_until_ready(out_big)
    ref_big = reference_forward(x_big, params)
    assert out_big.shape == (1037, outputs)
    assert jnp.allclose(out_big, ref_big, atol=1e-3, rtol=1e-3), "mismatch (large batch)"

    print("KERNEL_OK")
</pallas_src>

<mosaic_0001>
module attributes {stable_mosaic.version = 11 : i64} {
  func.func @_mlp_kernel(%arg0: i32, %arg1: memref<8x16xbf16, #tpu.memory_space<vmem>>, %arg2: memref<16x32xbf16, #tpu.memory_space<vmem>>, %arg3: memref<1x32xf32, #tpu.memory_space<vmem>>, %arg4: memref<32x32xbf16, #tpu.memory_space<vmem>>, %arg5: memref<1x32xf32, #tpu.memory_space<vmem>>, %arg6: memref<32x1xbf16, #tpu.memory_space<vmem>>, %arg7: memref<1x1xf32, #tpu.memory_space<vmem>>, %arg8: memref<8x1xf32, #tpu.memory_space<vmem>>) attributes {dimension_semantics = [#tpu.dimension_semantics<parallel>], iteration_bounds = array<i64: 1>, scalar_prefetch = 0 : i64, scratch_operands = 0 : i64, tpu.core_type = #tpu.core_type<tc>, window_params = [{transform_indices = @transform_0, window_bounds = array<i64: 8, 16>}, {pipeline_mode = #tpu.pipeline_mode<synchronous>, transform_indices = @transform_1, window_bounds = array<i64: 16, 32>}, {pipeline_mode = #tpu.pipeline_mode<synchronous>, transform_indices = @transform_2, window_bounds = array<i64: 1, 32>}, {pipeline_mode = #tpu.pipeline_mode<synchronous>, transform_indices = @transform_3, window_bounds = array<i64: 32, 32>}, {pipeline_mode = #tpu.pipeline_mode<synchronous>, transform_indices = @transform_4, window_bounds = array<i64: 1, 32>}, {pipeline_mode = #tpu.pipeline_mode<synchronous>, transform_indices = @transform_5, window_bounds = array<i64: 32, 1>}, {pipeline_mode = #tpu.pipeline_mode<synchronous>, transform_indices = @transform_6, window_bounds = array<i64: 1, 1>}, {transform_indices = @transform_7, window_bounds = array<i64: 8, 1>}]} {
    %c0 = arith.constant 0 : index
    %c0_0 = arith.constant 0 : index
    %0 = vector.load %arg1[%c0, %c0_0] : memref<8x16xbf16, #tpu.memory_space<vmem>>, vector<8x16xbf16>
    %c0_1 = arith.constant 0 : index
    %c0_2 = arith.constant 0 : index
    %1 = vector.load %arg2[%c0_1, %c0_2] : memref<16x32xbf16, #tpu.memory_space<vmem>>, vector<16x32xbf16>
    %cst = arith.constant dense<0.000000e+00> : vector<8x32xf32>
    %2 = tpu.matmul %0, %1, %cst {dimension_numbers = #tpu.dot_dimension_numbers<[1], [0], [0], [1], [0, 0, 1, 1], [], []>} : vector<8x16xbf16>, vector<16x32xbf16>, vector<8x32xf32> -> vector<8x32xf32>
    %c0_3 = arith.constant 0 : index
    %c0_4 = arith.constant 0 : index
    %3 = vector.load %arg3[%c0_3, %c0_4] : memref<1x32xf32, #tpu.memory_space<vmem>>, vector<1x32xf32>
    %4 = vector.broadcast %3 : vector<1x32xf32> to vector<8x32xf32>
    %5 = arith.addf %2, %4 : vector<8x32xf32>
    %cst_5 = arith.constant 0.000000e+00 : f32
    %6 = vector.broadcast %cst_5 : f32 to vector<8x32xf32>
    %7 = arith.maximumf %5, %6 : vector<8x32xf32>
    %8 = arith.truncf %7 : vector<8x32xf32> to vector<8x32xbf16>
    %c0_6 = arith.constant 0 : index
    %c0_7 = arith.constant 0 : index
    %9 = vector.load %arg4[%c0_6, %c0_7] : memref<32x32xbf16, #tpu.memory_space<vmem>>, vector<32x32xbf16>
    %cst_8 = arith.constant dense<0.000000e+00> : vector<8x32xf32>
    %10 = tpu.matmul %8, %9, %cst_8 {dimension_numbers = #tpu.dot_dimension_numbers<[1], [0], [0], [1], [0, 0, 1, 1], [], []>} : vector<8x32xbf16>, vector<32x32xbf16>, vector<8x32xf32> -> vector<8x32xf32>
    %c0_9 = arith.constant 0 : index
    %c0_10 = arith.constant 0 : index
    %11 = vector.load %arg5[%c0_9, %c0_10] : memref<1x32xf32, #tpu.memory_space<vmem>>, vector<1x32xf32>
    %12 = vector.broadcast %11 : vector<1x32xf32> to vector<8x32xf32>
    %13 = arith.addf %10, %12 : vector<8x32xf32>
    %cst_11 = arith.constant 0.000000e+00 : f32
    %14 = vector.broadcast %cst_11 : f32 to vector<8x32xf32>
    %15 = arith.maximumf %13, %14 : vector<8x32xf32>
    %16 = arith.truncf %15 : vector<8x32xf32> to vector<8x32xbf16>
    %c0_12 = arith.constant 0 : index
    %c0_13 = arith.constant 0 : index
    %17 = vector.load %arg6[%c0_12, %c0_13] : memref<32x1xbf16, #tpu.memory_space<vmem>>, vector<32x1xbf16>
    %cst_14 = arith.constant dense<0.000000e+00> : vector<8x1xf32>
    %18 = tpu.matmul %16, %17, %cst_14 {dimension_numbers = #tpu.dot_dimension_numbers<[1], [0], [0], [1], [0, 0, 1, 1], [], []>} : vector<8x32xbf16>, vector<32x1xbf16>, vector<8x1xf32> -> vector<8x1xf32>
    %c0_15 = arith.constant 0 : index
    %c0_16 = arith.constant 0 : index
    %19 = vector.load %arg7[%c0_15, %c0_16] : memref<1x1xf32, #tpu.memory_space<vmem>>, vector<1x1xf32>
    %20 = vector.broadcast %19 : vector<1x1xf32> to vector<8x1xf32>
    %21 = arith.addf %18, %20 : vector<8x1xf32>
    %c0_17 = arith.constant 0 : index
    %c0_18 = arith.constant 0 : index
    %22 = vector.load %arg8[%c0_17, %c0_18] : memref<8x1xf32, #tpu.memory_space<vmem>>, vector<8x1xf32>
    tpu.vector_store %arg8[%c0_17, %c0_18], %21 {strides = array<i32>} : memref<8x1xf32, #tpu.memory_space<vmem>>, vector<8x1xf32>,
    return
  }
  func.func @transform_0(%arg0: i32) -> (i32, i32) {
    %c0_i32 = arith.constant 0 : i32
    %c0_i32_0 = arith.constant 0 : i32
    return %arg0, %c0_i32 : i32, i32
  }
  func.func @transform_1(%arg0: i32) -> (i32, i32) {
    %c0_i32 = arith.constant 0 : i32
    %c0_i32_0 = arith.constant 0 : i32
    %c0_i32_1 = arith.constant 0 : i32
    return %c0_i32, %c0_i32_0 : i32, i32
  }
  func.func @transform_2(%arg0: i32) -> (i32, i32) {
    %c0_i32 = arith.constant 0 : i32
    %c0_i32_0 = arith.constant 0 : i32
    %c0_i32_1 = arith.constant 0 : i32
    return %c0_i32, %c0_i32_0 : i32, i32
  }
  func.func @transform_3(%arg0: i32) -> (i32, i32) {
    %c0_i32 = arith.constant 0 : i32
    %c0_i32_0 = arith.constant 0 : i32
    %c0_i32_1 = arith.constant 0 : i32
    return %c0_i32, %c0_i32_0 : i32, i32
  }
  func.func @transform_4(%arg0: i32) -> (i32, i32) {
    %c0_i32 = arith.constant 0 : i32
    %c0_i32_0 = arith.constant 0 : i32
    %c0_i32_1 = arith.constant 0 : i32
    return %c0_i32, %c0_i32_0 : i32, i32
  }
  func.func @transform_5(%arg0: i32) -> (i32, i32) {
    %c0_i32 = arith.constant 0 : i32
    %c0_i32_0 = arith.constant 0 : i32
    %c0_i32_1 = arith.constant 0 : i32
    return %c0_i32, %c0_i32_0 : i32, i32
  }
  func.func @transform_6(%arg0: i32) -> (i32, i32) {
    %c0_i32 = arith.constant 0 : i32
    %c0_i32_0 = arith.constant 0 : i32
    %c0_i32_1 = arith.constant 0 : i32
    return %c0_i32, %c0_i32_0 : i32, i32
  }
  func.func @transform_7(%arg0: i32) -> (i32, i32) {
    %c0_i32 = arith.constant 0 : i32
    %c0_i32_0 = arith.constant 0 : i32
    return %arg0, %c0_i32 : i32, i32
  }
}

</mosaic_0001>

<bundles_post_ra>
// kernel: enhanced_nn_forward.1
= control target key start
LH: loop header
LB: loop body
LE: loop exit
PB: predicated region body
PF: predicated region fallthrough
CT: control target
= control target key end

     0   :  { %vm42_vm0 = vcmask 130048   ;;  %vm81_vm1 = vcmask 261120   ;;  %vm136_vm2 = vcmask 7168   ;;  %s245_s1 = inlined_call_operand.vmem [shape: bf16[16,32], index: 1, kind: input, shape index: {}]   ;;  %s246_s0 = inlined_call_operand.vmem [shape: bf16[8,16], index: 0, kind: input, shape index: {}]   ;;  %s247_s2 = inlined_call_operand.vmem [shape: f32[1,32], index: 2, kind: input, shape index: {}]   ;;  %s248_s4 = inlined_call_operand.vmem [shape: f32[1,32], index: 4, kind: input, shape index: {}]   ;;  %s249_s3 = inlined_call_operand.vmem [shape: bf16[32,32], index: 3, kind: input, shape index: {}]   ;;  %s250_s5 = inlined_call_operand.vmem [shape: bf16[32,1], index: 5, kind: input, shape index: {}]   ;;  %s251_s6 = inlined_call_operand.<no memory space> [shape: f32[1,1], index: 6, kind: input, shape index: {}]   ;;  %s252_s7 = inlined_call_operand.vmem [shape: f32[8,1], index: 7, kind: output, shape index: {}]  }
   0x1   :  { %v165_v0 = vld [vmem:[%s245_s1] sm:$0xff]  ;;  %v167_v2 = vld [vmem:[%s249_s3 + $0x8] sm:$0xff]  ;;  %v12_v12 = vstv %s251_s6 }
   0x2   :  { %53 = vmatpush.bf16.msra.mxu0 %v165_v0  ;;  %v29_v1 = vld [vmem:[%s246_s0] sm:$0xf]  ;;  %91 = vmatpush.bf16.msra.mxu1 %v167_v2  ;;  %v169_v10 = vld [vmem:[%s250_s5 + $0x8] sm:$0xff]  ;;  %13 = vst [vmem:[#allocation2] sm:$0x1] %v12_v12 }
   0x3   :  { %v166_v3 = vld [vmem:[%s249_s3] sm:$0xff]  ;;  %129 = vmatpush.bf16.msra.mxu2 %v169_v10 }
   0x4   :  { %v170_v4 = vld [vmem:[%s247_s2] ss:$0 sm:$0xff] }
   0x5   :  { %146 = vmatmul.msk.bf16.vlgmr.msra.gmra.mxu0 %vm42_vm0, %v29_v1  ;;  %v168_v11 = vld [vmem:[%s250_s5] sm:$0xff] }
   0x6   :  { %92 = vmatpush.bf16.msra.mxu1 %v166_v3  ;;  %v171_v13 = vld [vmem:[%s248_s4] ss:$0 sm:$0xff] }
   0x7   :  { %130 = vmatpush.bf16.msra.mxu2 %v168_v11 }
   0x9   :  { %v172_v19 = vld [vmem:[#allocation2] ss:$0 sm:$0xff] }
  0x82   :  { %v55_v5 = vpop.f32.mrf.mxu0 }
  0x83   :  { %v56_v6 = vadd.f32 %v170_v4, %v55_v5 }
  0x85   :  { %v59_v7 = vmax.f32 %v56_v6, 0.0 }
  0x87   :  { %v60_v8 = vpack.c.bf16 %v59_v7, %v59_v7 }
  0x89   :  { %155 = vmatmul.msk.bf16.vlgmr.msra.gmra.mxu1 %vm81_vm1, %v60_v8 }
  0x8a   :  { %v57_v9 = vpop.f32.mrf.mxu0 }
 0x106   :  { %v94_v14 = vpop.f32.mrf.mxu1 }
 0x107   :  { %v95_v15 = vadd.f32 %v171_v13, %v94_v14 }
 0x109   :  { %v98_v16 = vmax.f32 %v95_v15, 0.0 }
 0x10b   :  { %v99_v17 = vpack.c.bf16 %v98_v16, %v98_v16 }
 0x10d   :  { %164 = vmatmul.msk.bf16.vlgmr.msra.gmra.mxu2 %vm81_vm1, %v99_v17 }
 0x10e   :  { %v96_v18 = vpop.f32.mrf.mxu1 }
 0x190   :  { %v132_v20 = vpop.f32.mrf.mxu2 }
 0x191   :  { %v133_v21 = vadd.f32 %v172_v19, %v132_v20 }
 0x193   :  { %137 = vst.msk [vmem:[%s252_s7] sm:$0xff] %vm136_vm2, %v133_v21 }
 0x198   :  { %v134_v22 = vpop.f32.mrf.mxu2 }

</bundles_post_ra>
